<compile_context>
chip_gen: v7x
topology: tpu7x:2x2x1
jax: 0.10.0
libtpu: 0.0.40
codegen_flags: <defaults>
</compile_context>

<pallas_src>
import functools

import jax
import jax.numpy as jnp
from jax import lax
from jax.experimental import pallas as pl
from jax.experimental.pallas import tpu as pltpu


def _vcreg_kernel(x_ref, gram_ref, std_ref, s_ref, *, B, C):
    """Partial VCReg sums for one (B*C, tile) HW slab.

    x_ref   : (B*C, tile) native-dtype block — raw row-major view of
              y = x.reshape(B, C, HW); row b*C + c  <->  y[b, c, :].
    gram_ref: (1, C, C) f32 OUTPUT block — per-core accumulator of
              sum_hw sum_b (y_b - m)(y_b - m)^T (rank-1-corrected per tile).
    std_ref : (1, 1, 1) f32 OUTPUT block — per-core accumulator of
              sum over (group j, hw) of relu(1 - std).
    s_ref   : (C, tile) f32 VMEM scratch holding sum_b y_b for this tile.
    """
    tile = x_ref.shape[1]
    j = pl.program_id(1)
    inv_B = 1.0 / B
    inv_Bm1 = 1.0 / (B - 1)

    @pl.when(j == 0)
    def _init():
        gram_ref[...] = jnp.zeros_like(gram_ref)
        std_ref[...] = jnp.zeros_like(std_ref)

    # ---------------- std branch (variance hinge) ----------------
    # torch view z = y.view(C, B, HW): group jg are the contiguous rows
    # [jg*B, (jg+1)*B).  Per group: contiguous (B, tile) load, sublane-axis
    # reduce (XLU), unbiased variance from sum / sum-of-squares, hinge.
    # Only a (1, tile) hinge accumulator stays live (no (C,tile) carries).
    def _std_group(zb_f32, hinge_acc):
        zs = jnp.sum(zb_f32, axis=0, keepdims=True)             # (1, tile)
        zq = jnp.sum(zb_f32 * zb_f32, axis=0, keepdims=True)    # (1, tile)
        var = (zq - zs * zs * inv_B) * inv_Bm1
        var = jnp.maximum(var, 0.0)          # clamp: E[x^2]-E[x]^2 cancellation
        std = jnp.sqrt(var + 1e-4)
        return hinge_acc + jnp.maximum(1.0 - std, 0.0)

    hinge_acc = jnp.zeros((1, tile), jnp.float32)
    if C <= 64:
        # Static unroll: static pl.ds starts, full LLO scheduler visibility.
        for jg in range(C):
            zb = x_ref[pl.ds(jg * B, B), :].astype(jnp.float32)
            hinge_acc = _std_group(zb, hinge_acc)
    else:
        # Large C: bounded-carry fori_loop (carry is only (1, tile)).
        def std_body(jg, acc):
            start = jg * B
            if B % 8 == 0:
                start = pl.multiple_of(start, 8)
            zb = x_ref[pl.ds(start, B), :].astype(jnp.float32)
            return _std_group(zb, acc)
        hinge_acc = lax.fori_loop(0, C, std_body, hinge_acc, unroll=8)

    part = jnp.sum(hinge_acc, axis=1, keepdims=True)             # (1, 1)
    std_ref[...] += part[None]

    # ---------------- covariance branch (method 'A') ----------------
    # Uncentered Gram + rank-1 correction per HW tile (exact: full B resident):
    #   sum_b (y_b - m)(y_b - m)^T
    #     = sum_b y_b y_b^T - (1/B)(sum_b y_b)(sum_b y_b)^T
    # Gram accumulates directly into the output block; sum_b y_b accumulates
    # into a VMEM scratch -> the loop carries nothing (no spills).
    s_ref[...] = jnp.zeros_like(s_ref)
    dnums = (((1,), (1,)), ((), ()))

    def _cov_step(yb):
        g = lax.dot_general(yb, yb, dnums, preferred_element_type=jnp.float32)
        gram_ref[...] += g[None]
        s_ref[...] += yb.astype(jnp.float32)

    if B <= 32:
        for b in range(B):                     # static starts, unrolled
            _cov_step(x_ref[pl.ds(b * C, C), :])
    else:
        @pl.loop(0, B)
        def _(b):
            start = b * C
            if C % 8 == 0:
                start = pl.multiple_of(start, 8)
            _cov_step(x_ref[pl.ds(start, C), :])

    s = s_ref[...]
    corr = lax.dot_general(s, s, dnums, preferred_element_type=jnp.float32)
    gram_ref[...] -= (corr * inv_B)[None]


def _pick_tile_hw(HW, B, C, elt_bytes, vmem_budget_bytes):
    """Largest multiple-of-128 divisor of HW whose working set fits the budget."""
    rows = B * C

    def vmem_needed(t):
        return (2 * rows * t * elt_bytes   # double-buffered input block
                + C * t * 4                # (C, tile) f32 s_ref scratch
                + 2 * C * C * 4            # gram output block (+ headroom)
                + (1 << 16))

    if HW % 128 != 0:
        return HW                          # irregular size: single block
    best = 128                             # fallback (see TODO for B-blocking)
    for t in range(128, HW + 1, 128):
        if HW % t == 0 and vmem_needed(t) <= vmem_budget_bytes:
            best = t
    return best


def vcreg_loss(x, *, std_coeff=25.0, cov_coeff=1.0, cov_methodA="1",
               tile_hw=None, vmem_budget_bytes=40 * 1024 * 1024,
               use_core_split=True):
    """VCReg forward (cov method 'A'). x is NCHW float (f32 or bf16). Scalar loss."""
    B, C, H, W = x.shape
    assert B >= 2, "unbiased variance / (B-1) needs B >= 2"
    HW = H * W

    # Single HBM buffer in the input's NATIVE dtype (no separate astype pass).
    # Both groupings (cov: rows [b*C,(b+1)*C); std: rows [j*B,(j+1)*B)) are
    # recovered in-kernel by row slicing of this one raw flatten.
    x_flat = x.reshape(B * C, HW)
    elt = jnp.dtype(x_flat.dtype).itemsize

    if cov_methodA == "1":
        cov_scale = 1.0 / (HW * (B - 1))   # cov_sum / hw / (batch_size - 1)
    else:                                  # '2'
        cov_scale = 1.0 / (B - 1)          # cov_sum / (batch_size - 1)

    if tile_hw is None:
        tile_hw = _pick_tile_hw(HW, B, C, elt, vmem_budget_bytes)
    assert HW % tile_hw == 0, (HW, tile_hw)
    num_tiles = HW // tile_hw

    # Leading "parallel" core axis: on v7x (2 TCs/chip) the HW tiles are
    # sharded across cores; on v5e/v6e it just runs serially (negligible cost).
    ncore = 2 if (use_core_split and num_tiles % 2 == 0) else 1
    tpc = num_tiles // ncore

    needed = (2 * B * C * tile_hw * elt + C * tile_hw * 4
              + 2 * C * C * 4 + (1 << 16))
    # Derived limit; stays well under v7x's 64 MiB for the default budget.
    vmem_limit = int(min(max(needed + (8 << 20), 32 << 20), 96 << 20))

    kernel = functools.partial(_vcreg_kernel, B=B, C=C)

    gram_parts, std_parts = pl.pallas_call(
        kernel,
        out_shape=(jax.ShapeDtypeStruct((ncore, C, C), jnp.float32),
                   jax.ShapeDtypeStruct((ncore, 1, 1), jnp.float32)),
        grid_spec=pltpu.PrefetchScalarGridSpec(
            num_scalar_prefetch=0,
            grid=(ncore, tpc),
            in_specs=[pl.BlockSpec((B * C, tile_hw),
                                   lambda i, j: (0, i * tpc + j))],
            out_specs=(pl.BlockSpec((1, C, C), lambda i, j: (i, 0, 0)),
                       pl.BlockSpec((1, 1, 1), lambda i, j: (i, 0, 0))),
            scratch_shapes=[pltpu.VMEM((C, tile_hw), jnp.float32)]),
        compiler_params=pltpu.CompilerParams(
            dimension_semantics=("parallel", "arbitrary"),
            vmem_limit_bytes=vmem_limit),
    )(x_flat)

    # Tiny O(C^2) epilogue in plain JAX (kept out of the kernel; also avoids a
    # shared scalar output block across cores).
    gram = jnp.sum(gram_parts, axis=0)                       # (C, C)
    std_sum = jnp.sum(std_parts)                             # scalar
    cov = gram * cov_scale
    cov_loss = (jnp.sum(cov * cov) - jnp.sum(jnp.diag(cov) ** 2)) / C
    std_loss = std_sum / (C * HW)
    return std_coeff * std_loss + cov_coeff * cov_loss


def vcreg_reference(x, *, std_coeff=25.0, cov_coeff=1.0, cov_methodA="1"):
    """Pure-JAX reference matching the PyTorch module (method 'A')."""
    B, C, H, W = x.shape
    HW = H * W
    y = x.reshape(B, C, HW).astype(jnp.float32)
    z = y.reshape(C, B, HW)                      # torch raw .view(C, B, HW)
    var = jnp.var(z, axis=1, ddof=1)
    std = jnp.sqrt(var + 1e-4)
    std_loss = jnp.mean(jnp.maximum(1.0 - std, 0.0))

    y_mean = jnp.mean(y, axis=0)
    yc = y - y_mean[None]
    cov_sum = jnp.einsum("bch,bdh->cd", yc, yc)
    cov_y = cov_sum / HW / (B - 1) if cov_methodA == "1" else cov_sum / (B - 1)
    off = cov_y - jnp.diag(jnp.diag(cov_y))
    cov_loss = jnp.sum(off ** 2) / C
    return std_coeff * std_loss + cov_coeff * cov_loss


if __name__ == "__main__":
    key = jax.random.PRNGKey(0)
    k1, k2, k3 = jax.random.split(key, 3)

    # Test 1: f32, single HW tile (ncore=1), cov_methodA='1'.
    x1 = jax.random.normal(k1, (2, 4, 16, 16), dtype=jnp.float32)
    out1 = jax.block_until_ready(vcreg_loss(x1, std_coeff=25.0, cov_coeff=1.0,
                                            cov_methodA="1"))
    ref1 = jax.block_until_ready(vcreg_reference(x1, cov_methodA="1"))
    assert jnp.isfinite(out1), "non-finite loss (test 1)"
    assert jnp.allclose(out1, ref1, rtol=1e-3, atol=1e-5), (out1, ref1)

    # Test 2: f32, forced small tiles -> 2-core grid split AND cross-tile
    # accumulation per core; cov_methodA='2'.
    x2 = jax.random.normal(k2, (4, 8, 16, 32), dtype=jnp.float32)
    out2 = jax.block_until_ready(vcreg_loss(x2, std_coeff=25.0, cov_coeff=1.0,
                                            cov_methodA="2", tile_hw=128))
    ref2 = jax.block_until_ready(vcreg_reference(x2, cov_methodA="2"))
    assert jnp.isfinite(out2), "non-finite loss (test 2)"
    assert jnp.allclose(out2, ref2, rtol=1e-3, atol=1e-5), (out2, ref2)

    # Test 3: native bf16 input path (no wrapper upcast; bf16 straight to MXU,
    # f32 in-kernel std math).
    x3 = jax.random.normal(k3, (8, 8, 16, 16), dtype=jnp.float32).astype(jnp.bfloat16)
    out3 = jax.block_until_ready(vcreg_loss(x3, std_coeff=25.0, cov_coeff=1.0,
                                            cov_methodA="1"))
    ref3 = jax.block_until_ready(
        vcreg_reference(x3.astype(jnp.float32), cov_methodA="1"))
    assert jnp.isfinite(out3), "non-finite loss (test 3)"
    assert jnp.allclose(out3, ref3, rtol=2e-2, atol=1e-3), (out3, ref3)

    print("KERNEL_OK")
</pallas_src>

<mosaic_0001>
module attributes {stable_mosaic.version = 11 : i64} {
  func.func @_vcreg_kernel(%arg0: i32, %arg1: i32, %arg2: memref<8x256xf32, #tpu.memory_space<vmem>>, %arg3: memref<1x4x4xf32, #tpu.memory_space<vmem>>, %arg4: memref<1x1x1xf32, #tpu.memory_space<vmem>>, %arg5: memref<4x256xf32, #tpu.memory_space<vmem>>) attributes {dimension_semantics = [#tpu.dimension_semantics<parallel>, #tpu.dimension_semantics<arbitrary>], iteration_bounds = array<i64: 1, 1>, scalar_prefetch = 0 : i64, scratch_operands = 1 : i64, tpu.core_type = #tpu.core_type<tc>, window_params = [{transform_indices = @transform_0, window_bounds = array<i64: 8, 256>}, {transform_indices = @transform_1, window_bounds = array<i64: 1, 4, 4>}, {transform_indices = @transform_2, window_bounds = array<i64: 1, 1, 1>}]} {
    %c0_i32 = arith.constant 0 : i32
    %0 = arith.cmpi eq, %arg1, %c0_i32 : i32
    %1 = arith.extui %0 : i1 to i32
    %c0_i32_0 = arith.constant 0 : i32
    %2 = arith.cmpi ne, %1, %c0_i32_0 : i32
    scf.if %2 {
      %cst_83 = arith.constant 0.000000e+00 : f32
      %126 = vector.broadcast %cst_83 : f32 to vector<1x4x4xf32>
      %c0_84 = arith.constant 0 : index
      %c0_85 = arith.constant 0 : index
      %c0_86 = arith.constant 0 : index
      %127 = vector.load %arg3[%c0_84, %c0_85, %c0_86] : memref<1x4x4xf32, #tpu.memory_space<vmem>>, vector<1x4x4xf32>
      tpu.vector_store %arg3[%c0_84, %c0_85, %c0_86], %126 {strides = array<i32>} : memref<1x4x4xf32, #tpu.memory_space<vmem>>, vector<1x4x4xf32>,
      %cst_87 = arith.constant 0.000000e+00 : f32
      %128 = vector.broadcast %cst_87 : f32 to vector<1x1x1xf32>
      %c0_88 = arith.constant 0 : index
      %c0_89 = arith.constant 0 : index
      %c0_90 = arith.constant 0 : index
      %129 = vector.load %arg4[%c0_88, %c0_89, %c0_90] : memref<1x1x1xf32, #tpu.memory_space<vmem>>, vector<1x1x1xf32>
      tpu.vector_store %arg4[%c0_88, %c0_89, %c0_90], %128 {strides = array<i32>} : memref<1x1x1xf32, #tpu.memory_space<vmem>>, vector<1x1x1xf32>,
    } else {
    }
    %cst = arith.constant 0.000000e+00 : f32
    %3 = vector.broadcast %cst : f32 to vector<1x256xf32>
    %c0 = arith.constant 0 : index
    %c0_1 = arith.constant 0 : index
    %4 = vector.load %arg2[%c0, %c0_1] : memref<8x256xf32, #tpu.memory_space<vmem>>, vector<2x256xf32>
    %cst_2 = arith.constant dense<0.000000e+00> : vector<256xf32>
    %5 = vector.multi_reduction <add>, %4, %cst_2 [0] : vector<2x256xf32> to vector<256xf32>
    %6 = vector.shape_cast %5 : vector<256xf32> to vector<1x256xf32>
    %7 = arith.mulf %4, %4 : vector<2x256xf32>
    %cst_3 = arith.constant dense<0.000000e+00> : vector<256xf32>
    %8 = vector.multi_reduction <add>, %7, %cst_3 [0] : vector<2x256xf32> to vector<256xf32>
    %9 = vector.shape_cast %8 : vector<256xf32> to vector<1x256xf32>
    %10 = arith.mulf %6, %6 : vector<1x256xf32>
    %cst_4 = arith.constant 5.000000e-01 : f32
    %11 = vector.broadcast %cst_4 : f32 to vector<1x256xf32>
    %12 = arith.mulf %10, %11 : vector<1x256xf32>
    %13 = arith.subf %9, %12 : vector<1x256xf32>
    %cst_5 = arith.constant 1.000000e+00 : f32
    %14 = vector.broadcast %cst_5 : f32 to vector<1x256xf32>
    %15 = arith.mulf %13, %14 : vector<1x256xf32>
    %cst_6 = arith.constant 0.000000e+00 : f32
    %16 = vector.broadcast %cst_6 : f32 to vector<1x256xf32>
    %17 = arith.maximumf %15, %16 : vector<1x256xf32>
    %cst_7 = arith.constant 9.99999974E-5 : f32
    %18 = vector.broadcast %cst_7 : f32 to vector<1x256xf32>
    %19 = arith.addf %17, %18 : vector<1x256xf32>
    %20 = math.sqrt %19 : vector<1x256xf32>
    %cst_8 = arith.constant 1.000000e+00 : f32
    %21 = vector.broadcast %cst_8 : f32 to vector<1x256xf32>
    %22 = arith.subf %21, %20 : vector<1x256xf32>
    %cst_9 = arith.constant 0.000000e+00 : f32
    %23 = vector.broadcast %cst_9 : f32 to vector<1x256xf32>
    %24 = arith.maximumf %22, %23 : vector<1x256xf32>
    %25 = arith.addf %3, %24 : vector<1x256xf32>
    %c2 = arith.constant 2 : index
    %c0_10 = arith.constant 0 : index
    %26 = vector.load %arg2[%c2, %c0_10] : memref<8x256xf32, #tpu.memory_space<vmem>>, vector<2x256xf32>
    %cst_11 = arith.constant dense<0.000000e+00> : vector<256xf32>
    %27 = vector.multi_reduction <add>, %26, %cst_11 [0] : vector<2x256xf32> to vector<256xf32>
    %28 = vector.shape_cast %27 : vector<256xf32> to vector<1x256xf32>
    %29 = arith.mulf %26, %26 : vector<2x256xf32>
    %cst_12 = arith.constant dense<0.000000e+00> : vector<256xf32>
    %30 = vector.multi_reduction <add>, %29, %cst_12 [0] : vector<2x256xf32> to vector<256xf32>
    %31 = vector.shape_cast %30 : vector<256xf32> to vector<1x256xf32>
    %32 = arith.mulf %28, %28 : vector<1x256xf32>
    %cst_13 = arith.constant 5.000000e-01 : f32
    %33 = vector.broadcast %cst_13 : f32 to vector<1x256xf32>
    %34 = arith.mulf %32, %33 : vector<1x256xf32>
    %35 = arith.subf %31, %34 : vector<1x256xf32>
    %cst_14 = arith.constant 1.000000e+00 : f32
    %36 = vector.broadcast %cst_14 : f32 to vector<1x256xf32>
    %37 = arith.mulf %35, %36 : vector<1x256xf32>
    %cst_15 = arith.constant 0.000000e+00 : f32
    %38 = vector.broadcast %cst_15 : f32 to vector<1x256xf32>
    %39 = arith.maximumf %37, %38 : vector<1x256xf32>
    %cst_16 = arith.constant 9.99999974E-5 : f32
    %40 = vector.broadcast %cst_16 : f32 to vector<1x256xf32>
    %41 = arith.addf %39, %40 : vector<1x256xf32>
    %42 = math.sqrt %41 : vector<1x256xf32>
    %cst_17 = arith.constant 1.000000e+00 : f32
    %43 = vector.broadcast %cst_17 : f32 to vector<1x256xf32>
    %44 = arith.subf %43, %42 : vector<1x256xf32>
    %cst_18 = arith.constant 0.000000e+00 : f32
    %45 = vector.broadcast %cst_18 : f32 to vector<1x256xf32>
    %46 = arith.maximumf %44, %45 : vector<1x256xf32>
    %47 = arith.addf %25, %46 : vector<1x256xf32>
    %c4 = arith.constant 4 : index
    %c0_19 = arith.constant 0 : index
    %48 = vector.load %arg2[%c4, %c0_19] : memref<8x256xf32, #tpu.memory_space<vmem>>, vector<2x256xf32>
    %cst_20 = arith.constant dense<0.000000e+00> : vector<256xf32>
    %49 = vector.multi_reduction <add>, %48, %cst_20 [0] : vector<2x256xf32> to vector<256xf32>
    %50 = vector.shape_cast %49 : vector<256xf32> to vector<1x256xf32>
    %51 = arith.mulf %48, %48 : vector<2x256xf32>
    %cst_21 = arith.constant dense<0.000000e+00> : vector<256xf32>
    %52 = vector.multi_reduction <add>, %51, %cst_21 [0] : vector<2x256xf32> to vector<256xf32>
    %53 = vector.shape_cast %52 : vector<256xf32> to vector<1x256xf32>
    %54 = arith.mulf %50, %50 : vector<1x256xf32>
    %cst_22 = arith.constant 5.000000e-01 : f32
    %55 = vector.broadcast %cst_22 : f32 to vector<1x256xf32>
    %56 = arith.mulf %54, %55 : vector<1x256xf32>
    %57 = arith.subf %53, %56 : vector<1x256xf32>
    %cst_23 = arith.constant 1.000000e+00 : f32
    %58 = vector.broadcast %cst_23 : f32 to vector<1x256xf32>
    %59 = arith.mulf %57, %58 : vector<1x256xf32>
    %cst_24 = arith.constant 0.000000e+00 : f32
    %60 = vector.broadcast %cst_24 : f32 to vector<1x256xf32>
    %61 = arith.maximumf %59, %60 : vector<1x256xf32>
    %cst_25 = arith.constant 9.99999974E-5 : f32
    %62 = vector.broadcast %cst_25 : f32 to vector<1x256xf32>
    %63 = arith.addf %61, %62 : vector<1x256xf32>
    %64 = math.sqrt %63 : vector<1x256xf32>
    %cst_26 = arith.constant 1.000000e+00 : f32
    %65 = vector.broadcast %cst_26 : f32 to vector<1x256xf32>
    %66 = arith.subf %65, %64 : vector<1x256xf32>
    %cst_27 = arith.constant 0.000000e+00 : f32
    %67 = vector.broadcast %cst_27 : f32 to vector<1x256xf32>
    %68 = arith.maximumf %66, %67 : vector<1x256xf32>
    %69 = arith.addf %47, %68 : vector<1x256xf32>
    %c6 = arith.constant 6 : index
    %c0_28 = arith.constant 0 : index
    %70 = vector.load %arg2[%c6, %c0_28] : memref<8x256xf32, #tpu.memory_space<vmem>>, vector<2x256xf32>
    %cst_29 = arith.constant dense<0.000000e+00> : vector<256xf32>
    %71 = vector.multi_reduction <add>, %70, %cst_29 [0] : vector<2x256xf32> to vector<256xf32>
    %72 = vector.shape_cast %71 : vector<256xf32> to vector<1x256xf32>
    %73 = arith.mulf %70, %70 : vector<2x256xf32>
    %cst_30 = arith.constant dense<0.000000e+00> : vector<256xf32>
    %74 = vector.multi_reduction <add>, %73, %cst_30 [0] : vector<2x256xf32> to vector<256xf32>
    %75 = vector.shape_cast %74 : vector<256xf32> to vector<1x256xf32>
    %76 = arith.mulf %72, %72 : vector<1x256xf32>
    %cst_31 = arith.constant 5.000000e-01 : f32
    %77 = vector.broadcast %cst_31 : f32 to vector<1x256xf32>
    %78 = arith.mulf %76, %77 : vector<1x256xf32>
    %79 = arith.subf %75, %78 : vector<1x256xf32>
    %cst_32 = arith.constant 1.000000e+00 : f32
    %80 = vector.broadcast %cst_32 : f32 to vector<1x256xf32>
    %81 = arith.mulf %79, %80 : vector<1x256xf32>
    %cst_33 = arith.constant 0.000000e+00 : f32
    %82 = vector.broadcast %cst_33 : f32 to vector<1x256xf32>
    %83 = arith.maximumf %81, %82 : vector<1x256xf32>
    %cst_34 = arith.constant 9.99999974E-5 : f32
    %84 = vector.broadcast %cst_34 : f32 to vector<1x256xf32>
    %85 = arith.addf %83, %84 : vector<1x256xf32>
    %86 = math.sqrt %85 : vector<1x256xf32>
    %cst_35 = arith.constant 1.000000e+00 : f32
    %87 = vector.broadcast %cst_35 : f32 to vector<1x256xf32>
    %88 = arith.subf %87, %86 : vector<1x256xf32>
    %cst_36 = arith.constant 0.000000e+00 : f32
    %89 = vector.broadcast %cst_36 : f32 to vector<1x256xf32>
    %90 = arith.maximumf %88, %89 : vector<1x256xf32>
    %91 = arith.addf %69, %90 : vector<1x256xf32>
    %cst_37 = arith.constant dense<0.000000e+00> : vector<1xf32>
    %92 = vector.multi_reduction <add>, %91, %cst_37 [1] : vector<1x256xf32> to vector<1xf32>
    %93 = vector.shape_cast %92 : vector<1xf32> to vector<1x1xf32>
    %c0_38 = arith.constant 0 : index
    %c0_39 = arith.constant 0 : index
    %c0_40 = arith.constant 0 : index
    %94 = vector.load %arg4[%c0_38, %c0_39, %c0_40] : memref<1x1x1xf32, #tpu.memory_space<vmem>>, vector<1x1x1xf32>
    %95 = vector.shape_cast %93 : vector<1x1xf32> to vector<1x1x1xf32>
    %96 = arith.addf %94, %95 : vector<1x1x1xf32>
    %c0_41 = arith.constant 0 : index
    %c0_42 = arith.constant 0 : index
    %c0_43 = arith.constant 0 : index
    %97 = vector.load %arg4[%c0_41, %c0_42, %c0_43] : memref<1x1x1xf32, #tpu.memory_space<vmem>>, vector<1x1x1xf32>
    tpu.vector_store %arg4[%c0_41, %c0_42, %c0_43], %96 {strides = array<i32>} : memref<1x1x1xf32, #tpu.memory_space<vmem>>, vector<1x1x1xf32>,
    %cst_44 = arith.constant 0.000000e+00 : f32
    %98 = vector.broadcast %cst_44 : f32 to vector<4x256xf32>
    %c0_45 = arith.constant 0 : index
    %c0_46 = arith.constant 0 : index
    %99 = vector.load %arg5[%c0_45, %c0_46] : memref<4x256xf32, #tpu.memory_space<vmem>>, vector<4x256xf32>
    tpu.vector_store %arg5[%c0_45, %c0_46], %98 {strides = array<i32>} : memref<4x256xf32, #tpu.memory_space<vmem>>, vector<4x256xf32>,
    %c0_47 = arith.constant 0 : index
    %c0_48 = arith.constant 0 : index
    %100 = vector.load %arg2[%c0_47, %c0_48] : memref<8x256xf32, #tpu.memory_space<vmem>>, vector<4x256xf32>
    %cst_49 = arith.constant dense<0.000000e+00> : vector<4x4xf32>
    %101 = tpu.matmul %100, %100, %cst_49 {dimension_numbers = #tpu.dot_dimension_numbers<[1], [1], [0], [0], [0, 0, 1, 0], [], []>} : vector<4x256xf32>, vector<4x256xf32>, vector<4x4xf32> -> vector<4x4xf32>
    %c0_50 = arith.constant 0 : index
    %c0_51 = arith.constant 0 : index
    %c0_52 = arith.constant 0 : index
    %102 = vector.load %arg3[%c0_50, %c0_51, %c0_52] : memref<1x4x4xf32, #tpu.memory_space<vmem>>, vector<1x4x4xf32>
    %103 = vector.shape_cast %101 : vector<4x4xf32> to vector<1x4x4xf32>
    %104 = arith.addf %102, %103 : vector<1x4x4xf32>
    %c0_53 = arith.constant 0 : index
    %c0_54 = arith.constant 0 : index
    %c0_55 = arith.constant 0 : index
    %105 = vector.load %arg3[%c0_53, %c0_54, %c0_55] : memref<1x4x4xf32, #tpu.memory_space<vmem>>, vector<1x4x4xf32>
    tpu.vector_store %arg3[%c0_53, %c0_54, %c0_55], %104 {strides = array<i32>} : memref<1x4x4xf32, #tpu.memory_space<vmem>>, vector<1x4x4xf32>,
    %c0_56 = arith.constant 0 : index
    %c0_57 = arith.constant 0 : index
    %106 = vector.load %arg5[%c0_56, %c0_57] : memref<4x256xf32, #tpu.memory_space<vmem>>, vector<4x256xf32>
    %107 = arith.addf %106, %100 : vector<4x256xf32>
    %c0_58 = arith.constant 0 : index
    %c0_59 = arith.constant 0 : index
    %108 = vector.load %arg5[%c0_58, %c0_59] : memref<4x256xf32, #tpu.memory_space<vmem>>, vector<4x256xf32>
    tpu.vector_store %arg5[%c0_58, %c0_59], %107 {strides = array<i32>} : memref<4x256xf32, #tpu.memory_space<vmem>>, vector<4x256xf32>,
    %c4_60 = arith.constant 4 : index
    %c0_61 = arith.constant 0 : index
    %109 = vector.load %arg2[%c4_60, %c0_61] : memref<8x256xf32, #tpu.memory_space<vmem>>, vector<4x256xf32>
    %cst_62 = arith.constant dense<0.000000e+00> : vector<4x4xf32>
    %110 = tpu.matmul %109, %109, %cst_62 {dimension_numbers = #tpu.dot_dimension_numbers<[1], [1], [0], [0], [0, 0, 1, 0], [], []>} : vector<4x256xf32>, vector<4x256xf32>, vector<4x4xf32> -> vector<4x4xf32>
    %c0_63 = arith.constant 0 : index
    %c0_64 = arith.constant 0 : index
    %c0_65 = arith.constant 0 : index
    %111 = vector.load %arg3[%c0_63, %c0_64, %c0_65] : memref<1x4x4xf32, #tpu.memory_space<vmem>>, vector<1x4x4xf32>
    %112 = vector.shape_cast %110 : vector<4x4xf32> to vector<1x4x4xf32>
    %113 = arith.addf %111, %112 : vector<1x4x4xf32>
    %c0_66 = arith.constant 0 : index
    %c0_67 = arith.constant 0 : index
    %c0_68 = arith.constant 0 : index
    %114 = vector.load %arg3[%c0_66, %c0_67, %c0_68] : memref<1x4x4xf32, #tpu.memory_space<vmem>>, vector<1x4x4xf32>
    tpu.vector_store %arg3[%c0_66, %c0_67, %c0_68], %113 {strides = array<i32>} : memref<1x4x4xf32, #tpu.memory_space<vmem>>, vector<1x4x4xf32>,
    %c0_69 = arith.constant 0 : index
    %c0_70 = arith.constant 0 : index
    %115 = vector.load %arg5[%c0_69, %c0_70] : memref<4x256xf32, #tpu.memory_space<vmem>>, vector<4x256xf32>
    %116 = arith.addf %115, %109 : vector<4x256xf32>
    %c0_71 = arith.constant 0 : index
    %c0_72 = arith.constant 0 : index
    %117 = vector.load %arg5[%c0_71, %c0_72] : memref<4x256xf32, #tpu.memory_space<vmem>>, vector<4x256xf32>
    tpu.vector_store %arg5[%c0_71, %c0_72], %116 {strides = array<i32>} : memref<4x256xf32, #tpu.memory_space<vmem>>, vector<4x256xf32>,
    %c0_73 = arith.constant 0 : index
    %c0_74 = arith.constant 0 : index
    %118 = vector.load %arg5[%c0_73, %c0_74] : memref<4x256xf32, #tpu.memory_space<vmem>>, vector<4x256xf32>
    %cst_75 = arith.constant dense<0.000000e+00> : vector<4x4xf32>
    %119 = tpu.matmul %118, %118, %cst_75 {dimension_numbers = #tpu.dot_dimension_numbers<[1], [1], [0], [0], [0, 0, 1, 0], [], []>} : vector<4x256xf32>, vector<4x256xf32>, vector<4x4xf32> -> vector<4x4xf32>
    %c0_76 = arith.constant 0 : index
    %c0_77 = arith.constant 0 : index
    %c0_78 = arith.constant 0 : index
    %120 = vector.load %arg3[%c0_76, %c0_77, %c0_78] : memref<1x4x4xf32, #tpu.memory_space<vmem>>, vector<1x4x4xf32>
    %cst_79 = arith.constant 5.000000e-01 : f32
    %121 = vector.broadcast %cst_79 : f32 to vector<4x4xf32>
    %122 = arith.mulf %119, %121 : vector<4x4xf32>
    %123 = vector.shape_cast %122 : vector<4x4xf32> to vector<1x4x4xf32>
    %124 = arith.subf %120, %123 : vector<1x4x4xf32>
    %c0_80 = arith.constant 0 : index
    %c0_81 = arith.constant 0 : index
    %c0_82 = arith.constant 0 : index
    %125 = vector.load %arg3[%c0_80, %c0_81, %c0_82] : memref<1x4x4xf32, #tpu.memory_space<vmem>>, vector<1x4x4xf32>
    tpu.vector_store %arg3[%c0_80, %c0_81, %c0_82], %124 {strides = array<i32>} : memref<1x4x4xf32, #tpu.memory_space<vmem>>, vector<1x4x4xf32>,
    return
  }
  func.func @transform_0(%arg0: i32, %arg1: i32) -> (i32, i32) {
    %c1_i32 = arith.constant 1 : i32
    %0 = arith.muli %arg0, %c1_i32 : i32
    %1 = arith.addi %0, %arg1 : i32
    %c0_i32 = arith.constant 0 : i32
    %c0_i32_0 = arith.constant 0 : i32
    return %c0_i32, %1 : i32, i32
  }
  func.func @transform_1(%arg0: i32, %arg1: i32) -> (i32, i32, i32) {
    %c0_i32 = arith.constant 0 : i32
    %c0_i32_0 = arith.constant 0 : i32
    %c0_i32_1 = arith.constant 0 : i32
    return %arg0, %c0_i32, %c0_i32_0 : i32, i32, i32
  }
  func.func @transform_2(%arg0: i32, %arg1: i32) -> (i32, i32, i32) {
    %c0_i32 = arith.constant 0 : i32
    %c0_i32_0 = arith.constant 0 : i32
    %c0_i32_1 = arith.constant 0 : i32
    return %arg0, %c0_i32, %c0_i32_0 : i32, i32, i32
  }
}

</mosaic_0001>

<bundles_post_ra>
// kernel: tpu_custom_call.1
= control target key start
LH: loop header
LB: loop body
LE: loop exit
PB: predicated region body
PF: predicated region fallthrough
CT: control target
= control target key end

     0   :  { %8 = vsyncpa [#allocation4], 0  ;;  %s845_s0 = inlined_call_operand.hbm [shape: f32[8,256], index: 0, kind: input, shape index: {}]   ;;  %s846_s1 = inlined_call_operand.hbm [shape: f32[1,4,4], index: 1, kind: output, shape index: {0}]   ;;  %s847_s2 = inlined_call_operand.hbm [shape: f32[1,1,1], index: 2, kind: output, shape index: {1}]  }
   0x1   :  { %9 = vsyncpa [#allocation5], 0 }
   0x2   :  { %10 = vsyncpa [#allocation8], 0  ;;  %s701_s9 = smov [#allocation3]   ;;  %s629_s13 = scalar_lea.hbm %s845_s0, 256 }
   0x3   :  { %s21_s10 = sshll.u32 %s701_s9, 4  ;;  %p630_p0 = scmp.ne.s32.totalorder %s845_s0, %s629_s13  ;;  %s22_s10 = int_to_ptr.vmem [resolvable:$true] %s21_s10 }
   0x4   :  { %p633_p1 = scmp.lt.u32.totalorder %s629_s13, %s845_s0 }
   0x6   :  { %p635_p2 = pnand %p633_p1, %p630_p0 }
   0x8   :  { %638 = shalt.err (!%p635_p2)
}
   0x9   :  { %s639_s18 = scalar_lea.vmem %s22_s10, 256  ;;  %p644_p4 = scmp.lt.s32.totalorder %s22_s10, %s22_s10 }
   0xa   :  { %p640_p3 = scmp.ne.s32.totalorder %s22_s10, %s639_s18  ;;  %p645_p5 = scmp.lt.s32.totalorder %s639_s18, %s639_s18 }
   0xc   :  { %p646_p6 = por %p645_p5, %p644_p4 }
   0xe   :  { %p647_p7 = pnand %p646_p6, %p640_p3 }
  0x10   :  { %650 = shalt.err (!%p647_p7)
}
  0x11   :  { %24 = dma.hbm_to_vmem [thread:$0]  %s845_s0, 256, %s22_s10, [#allocation4]  }
  0x12   :  { %695 = dma.done.wait [#allocation4], 256  }
  0x13   :  { %696 = vsyncadd [#allocation4], 4294967040  ;;  %vm34_vm0 = vcmask 27648   ;;  %v702_v0 = vmov 0.0   ;;  %vm40_vm1 = vcmask 1041408   ;;  %s703_s0 = smov [#allocation7]  }
  0x14   :  { %35 = vst.msk [vmem:[#allocation6] sm:$0xf] %vm34_vm0, %v702_v0  ;;  %v332_v1 = vld [vmem:[#allocation3 + $0x8] sm:$0xf]  ;;  %v331_v2 = vld [vmem:[#allocation3] sm:$0xf] }
  0x15   :  { %v415_v3 = vld [vmem:[#allocation3 + $0x8] sm:$0xf0]  ;;  %333 = vmatprep.subr.mxu0 %v332_v1  ;;  %v410_v4 = vcombine.low %v331_v2, %v332_v1  ;;  %397 = vmatprep.mubr.f32.mxu0 %v332_v1  ;;  %v414_v6 = vld [vmem:[#allocation3] sm:$0xf0]  ;;  %v38_v7 = vld [vmem:[#allocation3] sm:$0x3] }
  0x16   :  { %v419_v5 = vrot.slane %v415_v3, 4  ;;  %334 = vmatpush1.xpose.msra.mxu0 %v331_v2  ;;  %v418_v8 = vrot.slane %v414_v6, 4  ;;  %v496_v9 = vcombine.high %v414_v6, %v415_v3  ;;  %v39_v10 = vld [vmem:[#allocation3 + $0x8] sm:$0x3]  ;;  %v41_v11 = vsel %vm40_vm1, %v38_v7, 0.0  ;;  %s594_s21 = sshll.u32 %s703_s0, 4  ;;  %s595_s21 = int_to_ptr.vmem [resolvable:$true] %s594_s21 }
  0x17   :  { %v55_v12 = vmul.f32 %v38_v7, %v38_v7  ;;  %v101_v13 = vld [vmem:[#allocation3] sm:$0xc]  ;;  %v42_v14 = vrot.slane %v41_v11, 4  ;;  %v48_v15 = vsel %vm40_vm1, %v39_v10, 0.0  ;;  %v56_v16 = vmul.f32 %v39_v10, %v39_v10  ;;  %v102_v17 = vld [vmem:[#allocation3 + $0x8] sm:$0xc]  ;;  %p656_p9 = scmp.lt.s32.totalorder %s595_s21, %s595_s21 }
  0x18   :  { %422 = vmatprep.subr.mxu1 %v419_v5  ;;  %486 = vmatprep.mubr.f32.mxu1 %v419_v5  ;;  %v105_v18 = vrot.slane %v101_v13, 2  ;;  %v498_v19 = vadd.f32 %v496_v9, %v410_v4  ;;  %v49_v20 = vrot.slane %v48_v15, 4  ;;  %v106_v22 = vrot.slane %v102_v17, 2  ;;  %v175_v54 = vld [vmem:[#allocation3] sm:$0x30]  ;;  %s704_s22 = smov [#allocation6]  }
  0x19   :  { %423 = vmatpush1.xpose.msra.mxu1 %v418_v8  ;;  %v57_v21 = vsel %vm40_vm1, %v55_v12, 0.0  ;;  %398 = vmatmul.mubr.f32.vlgmr.msra.gmra.mrb[0].mxu0 %v331_v2  ;;  %v43_v23 = vadd.f32 %v42_v14, %v41_v11  ;;  %v64_v25 = vsel %vm40_vm1, %v56_v16, 0.0  ;;  %v123_v33 = vmul.f32 %v101_v13, %v101_v13  ;;  %v176_v58 = vld [vmem:[#allocation3 + $0x8] sm:$0x30]  ;;  %s584_s23 = sshll.u32 %s704_s22, 4  ;;  %s651_s24 = scalar_lea.vmem %s595_s21, 16  ;;  %s813_s23 = int_to_ptr.vmem [resolvable:$true] %s584_s23 }
  0x1a   :  { %v58_v24 = vrot.slane %v57_v21, 4  ;;  %v109_v26 = vsel %vm40_vm1, %v105_v18, 0.0  ;;  %v502_v27 = vcombine.high %v498_v19, %v498_v19  ;;  %v50_v28 = vadd.f32 %v49_v20, %v48_v15  ;;  %p652_p8 = scmp.ne.s32.totalorder %s595_s21, %s651_s24  ;;  %s655_s25 = scalar_lea.vmem %s595_s21, 32 }
  0x1b   :  { %v65_v29 = vrot.slane %v64_v25, 4  ;;  %v110_v30 = vrot.slane %v109_v26, 4  ;;  %v44_v31 = vrot.slane %v43_v23, 2  ;;  %v116_v32 = vsel %vm40_vm1, %v106_v22, 0.0  ;;  %p657_p10 = scmp.lt.s32.totalorder %s655_s25, %s651_s24 }
  0x1c   :  { %487 = vmatmul.mubr.f32.vlgmr.msra.gmra.mrb[0].mxu1 %v418_v8  ;;  %504 = vmatprep.subr.mxu0 %v502_v27  ;;  %v51_v34 = vrot.slane %v50_v28, 2  ;;  %v59_v35 = vadd.f32 %v58_v24, %v57_v21  ;;  %v117_v37 = vrot.slane %v116_v32, 4  ;;  %v124_v38 = vmul.f32 %v102_v17, %v102_v17 }
  0x1d   :  { %568 = vmatprep.mubr.f32.mxu0 %v502_v27  ;;  %v111_v36 = vadd.f32 %v110_v30, %v109_v26  ;;  %505 = vmatpush1.xpose.msra.mxu0 %v498_v19  ;;  %v127_v39 = vrot.slane %v123_v33, 2  ;;  %v45_v40 = vadd.f32 %v44_v31, %v43_v23  ;;  %v66_v41 = vadd.f32 %v65_v29, %v64_v25  ;;  %v249_v26 = vld [vmem:[#allocation3] sm:$0xc0]  ;;  %v250_v27 = vld [vmem:[#allocation3 + $0x8] sm:$0xc0]  ;;  %p658_p11 = por %p657_p10, %p656_p9 }
  0x1e   :  { %v118_v43 = vadd.f32 %v117_v37, %v116_v32  ;;  %v128_v44 = vrot.slane %v124_v38, 2  ;;  %v52_v46 = vadd.f32 %v51_v34, %v50_v28  ;;  %v60_v47 = vrot.slane %v59_v35, 2 }
  0x1f   :  { %v112_v42 = vrot.slane %v111_v36, 2  ;;  %v131_v45 = vsel %vm40_vm1, %v127_v39, 0.0  ;;  %v46_v52 = vrot.slane %v45_v40, 1  ;;  %v67_v53 = vrot.slane %v66_v41, 2  ;;  %p659_p12 = pnand %p658_p11, %p652_p8 }
  0x20   :  { %569 = vmatmul.mubr.f32.vlgmr.msra.gmra.mrb[2].mxu0 %v498_v19  ;;  %v119_v48 = vrot.slane %v118_v43, 2  ;;  %v132_v50 = vrot.slane %v131_v45, 4  ;;  %v138_v51 = vsel %vm40_vm1, %v128_v44, 0.0  ;;  %v53_v59 = vrot.slane %v52_v46, 1 }
  0x21   :  { %v113_v49 = vadd.f32 %v112_v42, %v111_v36  ;;  %v139_v57 = vrot.slane %v138_v51, 4  ;;  %v61_v60 = vadd.f32 %v60_v47, %v59_v35  ;;  %v179_v1 = vrot.slane %v175_v54, 4 }
  0x22   :  { %v120_v55 = vadd.f32 %v119_v48, %v118_v43  ;;  %v133_v56 = vadd.f32 %v132_v50, %v131_v45  ;;  %v47_v2 = vadd.f32 %v46_v52, %v45_v40  ;;  %v68_v3 = vadd.f32 %v67_v53, %v66_v41 }
  0x23   :  { %v114_v61 = vrot.slane %v113_v49, 1  ;;  %v140_v63 = vadd.f32 %v139_v57, %v138_v51  ;;  %v180_v4 = vrot.slane %v176_v58, 4  ;;  %v183_v7 = vsel %vm40_vm1, %v179_v1, 0.0 }
  0x24   :  { %v134_v62 = vrot.slane %v133_v56, 2  ;;  %v121_v5 = vrot.slane %v120_v55, 1  ;;  %v62_v8 = vrot.slane %v61_v60, 1  ;;  %v184_v9 = vrot.slane %v183_v7, 4 }
  0x25   :  { %v141_v6 = vrot.slane %v140_v63, 2  ;;  %v54_v10 = vadd.f32 %v53_v59, %v52_v46  ;;  %v115_v11 = vadd.f32 %v114_v61, %v113_v49  ;;  %v190_v13 = vsel %vm40_vm1, %v180_v4, 0.0 }
  0x26   :  { %v135_v12 = vadd.f32 %v134_v62, %v133_v56  ;;  %v69_v14 = vrot.slane %v68_v3, 1  ;;  %v71_v15 = vmul.f32 %v47_v2, %v47_v2  ;;  %v185_v16 = vadd.f32 %v184_v9, %v183_v7 }
  0x27   :  { %v191_v17 = vrot.slane %v190_v13, 4  ;;  %v122_v18 = vadd.f32 %v121_v5, %v120_v55  ;;  %v142_v19 = vadd.f32 %v141_v6, %v140_v63  ;;  %v197_v22 = vmul.f32 %v175_v54, %v175_v54 }
  0x28   :  { %v186_v20 = vrot.slane %v185_v16, 2  ;;  %v198_v23 = vmul.f32 %v176_v58, %v176_v58  ;;  %v136_v24 = vrot.slane %v135_v12, 1  ;;  %v145_v25 = vmul.f32 %v115_v11, %v115_v11 }
  0x29   :  { %v192_v21 = vadd.f32 %v191_v17, %v190_v13  ;;  %v63_v28 = vadd.f32 %v62_v8, %v61_v60  ;;  %v70_v29 = vadd.f32 %v69_v14, %v68_v3  ;;  %v72_v30 = vmul.f32 %v54_v10, %v54_v10 }
  0x2a   :  { %v73_v31 = vmul.f32 0.5, %v71_v15  ;;  %v143_v32 = vrot.slane %v142_v19, 1  ;;  %v146_v33 = vmul.f32 %v122_v18, %v122_v18  ;;  %v187_v34 = vadd.f32 %v186_v20, %v185_v16 }
  0x2b   :  { %v193_v35 = vrot.slane %v192_v21, 2  ;;  %v201_v36 = vrot.slane %v197_v22, 4  ;;  %v202_v37 = vrot.slane %v198_v23, 4  ;;  %v253_v38 = vrot.slane %v249_v26, 6 }
  0x2c   :  { %v254_v39 = vrot.slane %v250_v27, 6  ;;  %v137_v40 = vadd.f32 %v136_v24, %v135_v12  ;;  %v147_v41 = vmul.f32 0.5, %v145_v25  ;;  %v188_v42 = vrot.slane %v187_v34, 1 }
  0x2d   :  { %v194_v43 = vadd.f32 %v193_v35, %v192_v21  ;;  %v205_v44 = vsel %vm40_vm1, %v201_v36, 0.0  ;;  %v212_v45 = vsel %vm40_vm1, %v202_v37, 0.0  ;;  %v257_v46 = vsel %vm40_vm1, %v253_v38, 0.0 }
  0x2e   :  { %v264_v47 = vsel %vm40_vm1, %v254_v39, 0.0  ;;  %v74_v48 = vmul.f32 0.5, %v72_v30  ;;  %v144_v49 = vadd.f32 %v143_v32, %v142_v19  ;;  %v148_v50 = vmul.f32 0.5, %v146_v33 }
  0x2f   :  { %v195_v51 = vrot.slane %v194_v43, 1  ;;  %v189_v52 = vadd.f32 %v188_v42, %v187_v34  ;;  %v206_v53 = vrot.slane %v205_v44, 4  ;;  %v213_v54 = vrot.slane %v212_v45, 4 }
  0x30   :  { %v75_v55 = vsub.f32 %v63_v28, %v73_v31  ;;  %v258_v56 = vrot.slane %v257_v46, 4  ;;  %v265_v57 = vrot.slane %v264_v47, 4  ;;  %v149_v58 = vsub.f32 %v137_v40, %v147_v41 }
  0x31   :  { %v196_v59 = vadd.f32 %v195_v51, %v194_v43  ;;  %v207_v60 = vadd.f32 %v206_v53, %v205_v44  ;;  %v214_v61 = vadd.f32 %v213_v54, %v212_v45  ;;  %v76_v62 = vsub.f32 %v70_v29, %v74_v48 }
  0x32   :  { %v150_v63 = vsub.f32 %v144_v49, %v148_v50  ;;  %v219_v3 = vmul.f32 %v189_v52, %v189_v52  ;;  %v77_v4 = vmax.f32 %v75_v55, 0.0  ;;  %v259_v6 = vadd.f32 %v258_v56, %v257_v46 }
  0x33   :  { %v208_v1 = vrot.slane %v207_v60, 2  ;;  %v215_v2 = vrot.slane %v214_v61, 2  ;;  %v220_v5 = vmul.f32 %v196_v59, %v196_v59  ;;  %v266_v7 = vadd.f32 %v265_v57, %v264_v47 }
  0x34   :  { %v151_v8 = vmax.f32 %v149_v58, 0.0  ;;  %v78_v11 = vmax.f32 %v76_v62, 0.0  ;;  %v152_v12 = vmax.f32 %v150_v63, 0.0  ;;  %v260_v13 = vrot.slane %v259_v6, 2 }
  0x35   :  { %v209_v9 = vadd.f32 %v208_v1, %v207_v60  ;;  %v216_v10 = vadd.f32 %v215_v2, %v214_v61  ;;  %v221_v16 = vmul.f32 0.5, %v219_v3  ;;  %v222_v17 = vmul.f32 0.5, %v220_v5 }
  0x36   :  { %v748_v18 = vadd.f32 0.0001, %v77_v4  ;;  %v261_v19 = vadd.f32 %v260_v13, %v259_v6  ;;  %v267_v20 = vrot.slane %v266_v7, 2  ;;  %v271_v21 = vmul.f32 %v249_v26, %v249_v26 }
  0x37   :  { %v210_v14 = vrot.slane %v209_v9, 1  ;;  %v217_v15 = vrot.slane %v216_v10, 1  ;;  %v750_v22 = vadd.f32 0.0001, %v151_v8  ;;  %v272_v25 = vmul.f32 %v250_v27, %v250_v27 }
  0x38   :  { %v752_v28 = vadd.f32 0.0001, %v78_v11  ;;  %v268_v29 = vadd.f32 %v267_v20, %v266_v7  ;;  %v275_v30 = vrot.slane %v271_v21, 6  ;;  %v754_v31 = vadd.f32 0.0001, %v152_v12 }
  0x39   :  { %v211_v23 = vadd.f32 %v210_v14, %v209_v9  ;;  %v218_v24 = vadd.f32 %v217_v15, %v216_v10  ;;  %v276_v34 = vrot.slane %v272_v25, 6  ;;  %613 = vrsqrt.f32 %v748_v18 }
  0x3a   :  { %v262_v35 = vrot.slane %v261_v19, 1  ;;  %v279_v36 = vsel %vm40_vm1, %v275_v30, 0.0  ;;  %615 = vrsqrt.f32 %v750_v22  ;;  %v269_v27 = vrot.slane %v268_v29, 1 }
  0x3b   :  { %v223_v32 = vsub.f32 %v211_v23, %v221_v16  ;;  %v224_v33 = vsub.f32 %v218_v24, %v222_v17  ;;  %617 = vrsqrt.f32 %v752_v28  ;;  %v280_v38 = vrot.slane %v279_v36, 4 }
  0x3c   :  { %v286_v39 = vsel %vm40_vm1, %v276_v34, 0.0  ;;  %619 = vrsqrt.f32 %v754_v31  ;;  %v263_v42 = vadd.f32 %v262_v35, %v261_v19  ;;  %v270_v45 = vadd.f32 %v269_v27, %v268_v29 }
  0x3d   :  { %v225_v26 = vmax.f32 %v223_v32, 0.0  ;;  %v226_v37 = vmax.f32 %v224_v33, 0.0  ;;  %v281_v43 = vadd.f32 %v280_v38, %v279_v36  ;;  %v287_v44 = vrot.slane %v286_v39, 4 }
  0x3e   :  { %v293_v48 = vmul.f32 %v263_v42, %v263_v42  ;;  %v294_v52 = vmul.f32 %v270_v45, %v270_v45  ;;  %vm83_vm2 = vcmp.eq.f32.partialorder %v748_v18, inf  ;;  %vm85_vm3 = vcmp.eq.f32.partialorder %v748_v18, 0.0 }
  0x3f   :  { %v762_v40 = vadd.f32 0.0001, %v225_v26  ;;  %v764_v41 = vadd.f32 0.0001, %v226_v37  ;;  %v282_v46 = vrot.slane %v281_v43, 2  ;;  %v288_v47 = vadd.f32 %v287_v44, %v286_v39 }
  0x40   :  { %v295_v57 = vmul.f32 0.5, %v293_v48  ;;  %v296_v63 = vmul.f32 0.5, %v294_v52  ;;  %v86_v1 = vand.u32 2147483648, %v748_v18  ;;  %vm90_vm4 = vcmp.eq.f32.partialorder %v752_v28, inf }
  0x41   :  { %621 = vrsqrt.f32 %v762_v40  ;;  %v283_v50 = vadd.f32 %v282_v46, %v281_v43  ;;  %v289_v51 = vrot.slane %v288_v47, 2  ;;  %vm157_vm5 = vcmp.eq.f32.partialorder %v750_v22, inf }
  0x42   :  { %623 = vrsqrt.f32 %v764_v41  ;;  %vm92_vm6 = vcmp.eq.f32.partialorder %v752_v28, 0.0  ;;  %v93_v7 = vand.u32 2147483648, %v752_v28  ;;  %vm159_vm7 = vcmp.eq.f32.partialorder %v750_v22, 0.0 }
  0x43   :  { %v614_v49 = vpop.eup %613  ;;  %v284_v55 = vrot.slane %v283_v50, 1  ;;  %v290_v56 = vadd.f32 %v289_v51, %v288_v47  ;;  %v160_v8 = vand.u32 2147483648, %v750_v22  ;;  %vm164_vm8 = vcmp.eq.f32.partialorder %v754_v31, inf }
  0x44   :  { %v616_v53 = vpop.eup %615  ;;  %v82_v59 = vmul.f32 %v614_v49, %v748_v18  ;;  %vm166_vm9 = vcmp.eq.f32.partialorder %v754_v31, 0.0  ;;  %v167_v15 = vand.u32 2147483648, %v754_v31  ;;  %vm231_vm10 = vcmp.eq.f32.partialorder %v762_v40, inf }
  0x45   :  { %v618_v54 = vpop.eup %617  ;;  %v156_v60 = vmul.f32 %v616_v53, %v750_v22  ;;  %v285_v61 = vadd.f32 %v284_v55, %v283_v50  ;;  %v291_v62 = vrot.slane %v290_v56, 1  ;;  %v234_v25 = vand.u32 2147483648, %v762_v40 }
  0x46   :  { %v620_v58 = vpop.eup %619  ;;  %v89_v2 = vmul.f32 %v618_v54, %v752_v28  ;;  %v84_v10 = vsel %vm83_vm2, %v748_v18, %v82_v59  ;;  %vm238_vm11 = vcmp.eq.f32.partialorder %v764_v41, inf  ;;  %vm233_vm12 = vcmp.eq.f32.partialorder %v762_v40, 0.0 }
  0x47   :  { %v163_v4 = vmul.f32 %v620_v58, %v754_v31  ;;  %v292_v5 = vadd.f32 %v291_v62, %v290_v56  ;;  %v297_v6 = vsub.f32 %v285_v61, %v295_v57  ;;  %v158_v11 = vsel %vm157_vm5, %v750_v22, %v156_v60 }
  0x48   :  { %v91_v14 = vsel %vm90_vm4, %v752_v28, %v89_v2  ;;  %v87_v21 = vsel %vm85_vm3, %v86_v1, %v84_v10  ;;  %v161_v23 = vsel %vm159_vm7, %v160_v8, %v158_v11  ;;  %v241_v18 = vand.u32 2147483648, %v764_v41  ;;  %v403_v2 = vld [vmem:[#allocation6] sm:$0xf] }
  0x49   :  { %v298_v12 = vsub.f32 %v292_v5, %v296_v63  ;;  %v299_v13 = vmax.f32 %v297_v6, 0.0  ;;  %v165_v17 = vsel %vm164_vm8, %v754_v31, %v163_v4  ;;  %v94_v30 = vsel %vm92_vm6, %v93_v7, %v91_v14 }
  0x4a   :  { %v168_v31 = vsel %vm166_vm9, %v167_v15, %v165_v17  ;;  %v95_v22 = vsub.f32 1.0, %v87_v21  ;;  %v169_v33 = vsub.f32 1.0, %v161_v23  ;;  %vm240_vm13 = vcmp.eq.f32.partialorder %v764_v41, 0.0 }
  0x4b   :  { %v622_v3 = vpop.eup %621  ;;  %v300_v19 = vmax.f32 %v298_v12, 0.0  ;;  %v301_v20 = vadd.f32 0.0001, %v299_v13  ;;  %v96_v35 = vsub.f32 1.0, %v94_v30  ;;  %v170_v36 = vsub.f32 1.0, %v168_v31 }
  0x4c   :  { %v624_v9 = vpop.eup %623  ;;  %v230_v16 = vmul.f32 %v622_v3, %v762_v40  ;;  %v97_v28 = vmax.f32 %v95_v22, 0.0  ;;  %v171_v27 = vmax.f32 %v169_v33, 0.0  ;;  %vm36_vm3 = vcmask 0  }
  0x4d   :  { %v237_v24 = vmul.f32 %v624_v9, %v764_v41  ;;  %v302_v29 = vadd.f32 0.0001, %v300_v19  ;;  %625 = vrsqrt.f32 %v301_v20  ;;  %v98_v39 = vmax.f32 %v96_v35, 0.0  ;;  %37 = vst.msk [vmem:[#allocation7] sm:$0x1] %vm36_vm3, %v702_v0 }
  0x4e   :  { %v232_v32 = vsel %vm231_vm10, %v762_v40, %v230_v16  ;;  %v172_v42 = vmax.f32 %v170_v36, 0.0  ;;  %vm305_vm14 = vcmp.eq.f32.partialorder %v301_v20, inf  ;;  %v308_v44 = vand.u32 2147483648, %v301_v20 }
  0x4f   :  { %627 = vrsqrt.f32 %v302_v29  ;;  %v239_v34 = vsel %vm238_vm11, %v764_v41, %v237_v24  ;;  %v235_v26 = vsel %vm233_vm12, %v234_v25, %v232_v32  ;;  %v173_v45 = vadd.f32 %v171_v27, %v97_v28 }
  0x50   :  { %v242_v37 = vsel %vm240_vm13, %v241_v18, %v239_v34  ;;  %v243_v38 = vsub.f32 1.0, %v235_v26  ;;  %vm307_vm15 = vcmp.eq.f32.partialorder %v301_v20, 0.0  ;;  %v174_v49 = vadd.f32 %v172_v42, %v98_v39 }
  0x51   :  { %v244_v43 = vsub.f32 1.0, %v242_v37  ;;  %vm312_vm1 = vcmp.eq.f32.partialorder %v302_v29, inf  ;;  %v315_v41 = vand.u32 2147483648, %v302_v29  ;;  %vm314_vm2 = vcmp.eq.f32.partialorder %v302_v29, 0.0 }
  0x52   :  { %v245_v46 = vmax.f32 %v243_v38, 0.0 }
  0x53   :  { %v246_v50 = vmax.f32 %v244_v43, 0.0 }
  0x54   :  { %v247_v54 = vadd.f32 %v245_v46, %v173_v45  ;;  %v326_v12 = vld [vmem:[#allocation7] sm:$0x1] }
  0x55   :  { %v248_v58 = vadd.f32 %v246_v50, %v174_v49 }
  0x57   :  { %v626_v40 = vpop.eup %625 }
  0x58   :  { %v304_v47 = vmul.f32 %v626_v40, %v301_v20 }
  0x59   :  { %v628_v48 = vpop.eup %627 }
  0x5a   :  { %v306_v51 = vsel %vm305_vm14, %v301_v20, %v304_v47  ;;  %v311_v52 = vmul.f32 %v628_v48, %v302_v29 }
  0x5b   :  { %v309_v53 = vsel %vm307_vm15, %v308_v44, %v306_v51 }
  0x5c   :  { %v313_v55 = vsel %vm312_vm1, %v302_v29, %v311_v52  ;;  %v317_v56 = vsub.f32 1.0, %v309_v53 }
  0x5d   :  { %v316_v57 = vsel %vm314_vm2, %v315_v41, %v313_v55 }
  0x5e   :  { %v318_v59 = vsub.f32 1.0, %v316_v57  ;;  %v319_v60 = vmax.f32 %v317_v56, 0.0 }
  0x60   :  { %v320_v61 = vmax.f32 %v318_v59, 0.0  ;;  %v321_v62 = vadd.f32 %v319_v60, %v247_v54 }
  0x62   :  { %v322_v63 = vadd.f32 %v320_v61, %v248_v58 }
  0x64   :  { %v323_v1 = vadd.f32 %v322_v63, %v321_v62 }
  0x66   :  { %324 = vadd.xlane.f32.xlu0 %v323_v1 }
  0xec   :  { %v399_v3 = vpop.f32.mrb[0].mxu0 }
  0xed   :  { %v404_v4 = vadd.f32 %v403_v2, %v399_v3  ;;  %v401_v5 = vpop.f32.mrb[1].mxu0 }
  0xef   :  { %v488_v6 = vpop.f32.mrb[0].mxu1  ;;  %406 = vst.msk [vmem:[#allocation6] sm:$0xf] %vm34_vm0, %v404_v4 }
  0xf0   :  { %v490_v7 = vpop.f32.mrb[1].mxu1 }
  0xf3   :  { %v570_v8 = vpop.f32.mrb[2].mxu0  ;;  %v325_v14 = vpop.xlane.xlu0 %324 }
  0xf4   :  { %v572_v9 = vpop.f32.mrb[3].mxu0  ;;  %v575_v13 = vmul.f32 0.5, %v570_v8  ;;  %v327_v0 = vadd.f32 %v326_v12, %v325_v14 }
  0xf6   :  { %v492_v10 = vld [vmem:[#allocation6] sm:$0xf]  ;;  %329 = vst.msk [vmem:[#allocation7] sm:$0x1] %vm36_vm3, %v327_v0 }
  0xf7   :  { %v493_v11 = vadd.f32 %v492_v10, %v488_v6 }
  0xf9   :  { %494 = vst.msk [vmem:[#allocation6] sm:$0xf] %vm34_vm0, %v493_v11 }
 0x100   :  { %v574_v15 = vld [vmem:[#allocation6] sm:$0xf] }
 0x101   :  { %v576_v16 = vsub.f32 %v574_v15, %v575_v13 }
 0x102   :  { %662 = shalt.err (!%p659_p12)
}
 0x103   :  { %s663_s28 = scalar_lea.hbm %s847_s2, 16 }
 0x104   :  { %p664_p13 = scmp.ne.s32.totalorder %s847_s2, %s663_s28  ;;  %p667_p0 = scmp.lt.u32.totalorder %s663_s28, %s847_s2 }
 0x106   :  { %p669_p1 = pnand %p667_p0, %p664_p13 }
 0x108   :  { %672 = shalt.err (!%p669_p1)
}
 0x109   :  { %597 = dma.vmem_to_hbm [thread:$0]  %s595_s21, 16, %s847_s2, [#allocation8]   ;;  %577 = vst.msk [vmem:[#allocation6] sm:$0xf] %vm34_vm0, %v576_v16 }
 0x10a   :  { %s673_s7 = scalar_lea.vmem %s813_s23, 64  ;;  %p678_p3 = scmp.lt.s32.totalorder %s813_s23, %s813_s23 }
 0x10b   :  { %p674_p2 = scmp.ne.s32.totalorder %s813_s23, %s673_s7  ;;  %p679_p4 = scmp.lt.s32.totalorder %s673_s7, %s673_s7 }
 0x10d   :  { %p680_p5 = por %p679_p4, %p678_p3 }
 0x10f   :  { %p681_p6 = pnand %p680_p5, %p674_p2 }
 0x111   :  { %684 = shalt.err (!%p681_p6)
}
 0x112   :  { %s685_s10 = scalar_lea.hbm %s846_s1, 64 }
 0x113   :  { %p686_p7 = scmp.ne.s32.totalorder %s846_s1, %s685_s10  ;;  %p689_p8 = scmp.lt.u32.totalorder %s685_s10, %s846_s1 }
 0x115   :  { %p691_p9 = pnand %p689_p8, %p686_p7 }
 0x117   :  { %694 = shalt.err (!%p691_p9)
}
 0x118   :  { %587 = dma.vmem_to_hbm [thread:$0]  %s813_s23, 64, %s846_s1, [#allocation5]  }
 0x119   :  { %697 = dma.done.wait [#allocation5], 64  }
 0x11a   :  { %698 = vsyncadd [#allocation5], 4294967232 }
 0x11b   :  { %699 = dma.done.wait [#allocation8], 16  }
 0x11c   :  { %700 = vsyncadd [#allocation8], 4294967280 }
 0x11d   :  { %604 = vsyncpa [#allocation4], 1 }
 0x11e   :  { %605 = vsyncpa [#allocation5], 1 }
 0x11f   :  { %606 = vsyncpa [#allocation8], 1 }

</bundles_post_ra>
